<compile_context>
chip_gen: v6e
topology: v6e:2x2x1
jax: 0.10.0
libtpu: 0.0.40
codegen_flags: <defaults>
</compile_context>

<pallas_src>
import functools

import jax
import jax.numpy as jnp
from jax.experimental import pallas as pl
from jax.experimental.pallas import tpu as pltpu


# ---------------------------------------------------------------------------
# Kernels
# ---------------------------------------------------------------------------

def _se_fused_kernel(x_ref, w1t_ref, w2t_ref, o_ref, *, inv_l):
    """Single pass: squeeze (mean over L), excite (MLP + sigmoid), scale."""
    x = x_ref[...]                                                    # (bt, C, L)
    # Squeeze: f32 accumulation without a full-tile f32 temp.
    mean = jnp.sum(x, axis=-1, dtype=jnp.float32) * inv_l             # (bt, C)
    # Excite: plain (M,K)x(K,N) matmuls on pre-transposed weights.
    h = jnp.maximum(
        jnp.dot(mean, w1t_ref[...], preferred_element_type=jnp.float32), 0.0)   # (bt, H)
    s = jax.nn.sigmoid(
        jnp.dot(h, w2t_ref[...], preferred_element_type=jnp.float32))           # (bt, C)
    # Scale: broadcast multiply over L in the input dtype.
    o_ref[...] = (x * s[:, :, None].astype(x.dtype)).astype(o_ref.dtype)


def _squeeze_excite_kernel(x_ref, w1t_ref, w2t_ref, s_ref, acc_ref, *, inv_l):
    """Fallback pass 1: L-tiled sum reduction; excite MLP on the last L chunk."""
    li = pl.program_id(1)

    @pl.when(li == 0)
    def _():
        acc_ref[...] = jnp.zeros_like(acc_ref)

    acc_ref[...] += jnp.sum(x_ref[...], axis=-1, dtype=jnp.float32)   # (b1, C)

    @pl.when(li == pl.num_programs(1) - 1)
    def _():
        mean = acc_ref[...] * inv_l                                   # (b1, C)
        h = jnp.maximum(
            jnp.dot(mean, w1t_ref[...], preferred_element_type=jnp.float32), 0.0)
        s = jax.nn.sigmoid(
            jnp.dot(h, w2t_ref[...], preferred_element_type=jnp.float32))       # (b1, C)
        s_ref[...] = s[:, :, None]                                    # (b1, C, 1)


def _scale_kernel(x_ref, s_ref, o_ref):
    """Fallback pass 2: L-tiled broadcast scale."""
    x = x_ref[...]                                                    # (b1, C, l_tile)
    s = s_ref[...]                                                    # (b1, C, 1)
    o_ref[...] = (x * s.astype(x.dtype)).astype(o_ref.dtype)


# ---------------------------------------------------------------------------
# Wrapper
# ---------------------------------------------------------------------------

def _round_up(v, m):
    return (v + m - 1) // m * m


def _pad_to(a, axis, size):
    cur = a.shape[axis]
    if cur == size:
        return a
    pads = [(0, 0)] * a.ndim
    pads[axis] = (0, size - cur)
    return jnp.pad(a, pads)


def _tpu_vmem_and_cores():
    """Generation-aware VMEM capacity (bytes) and TensorCore count, with safe defaults."""
    vmem_cap = 64 << 20       # conservative default (v7x per-TC)
    num_cores = 1
    try:
        info = pltpu.get_tpu_info()
        cap = getattr(info, "vmem_capacity_bytes", None)
        if cap:
            vmem_cap = int(cap)
        for attr in ("num_cores", "core_count", "num_tensorcores", "tensorcore_count"):
            v = getattr(info, attr, None)
            if v:
                num_cores = int(v)
                break
    except Exception:
        pass
    return vmem_cap, num_cores


def se_layer(x, w1, w2, *, target_tile_bytes=8 << 20, donate_input=False):
    """x: (B, C, L); w1: (C//r, C); w2: (C, C//r) (PyTorch Linear layout). Returns x * SE(x)."""
    B, C, L = x.shape
    H = w1.shape[0]
    dtype = x.dtype
    itemsize = jnp.dtype(dtype).itemsize
    inv_l = 1.0 / float(L)

    # Pre-transpose weights once in the wrapper so both in-kernel matmuls are (M,K)x(K,N).
    w1t = jnp.asarray(w1).T                                           # (C, H)
    w2t = jnp.asarray(w2).T                                           # (H, C)
    w_bytes = (w1t.size * jnp.dtype(w1t.dtype).itemsize
               + w2t.size * jnp.dtype(w2t.dtype).itemsize)

    vmem_cap, num_cores = _tpu_vmem_and_cores()
    vmem_ceiling = (vmem_cap * 3) // 4       # ~48 MiB on v7x, ~96 MiB on v5e/v6e
    slack = 2 << 20
    # Per-tile budget: (in + out) double-buffered = 4 tiles, plus resident weights.
    tile_budget = max(0, (vmem_ceiling - 4 * w_bytes - slack) // 4)

    # Lane-dense output: pad L to a 128 multiple only if the extra traffic is <= 1/8;
    # otherwise keep the full-L block (block dim == full array dim is always legal).
    Lp = _round_up(L, 128)
    if Lp != L and (Lp - L) * 8 > L:
        Lp = L
    per_batch_bytes = C * Lp * itemsize

    cost = pl.CostEstimate(
        flops=3 * B * C * L + 4 * B * C * H,
        transcendentals=B * C,                               # sigmoid
        bytes_accessed=2 * B * C * L * itemsize + w_bytes,
    )

    if per_batch_bytes <= tile_budget:
        # -------------------- single-pass fused path --------------------
        b_tile = int(max(1, min(B,
                                target_tile_bytes // per_batch_bytes,
                                tile_budget // per_batch_bytes)))
        Bp = _round_up(B, b_tile)
        grid_len = Bp // b_tile
        # Even grid on multi-TensorCore parts so no core strands on the tail step.
        if num_cores >= 2 and grid_len > 1 and grid_len % 2 == 1:
            grid_len += 1
            Bp = grid_len * b_tile

        xp = _pad_to(_pad_to(x, 2, Lp), 0, Bp)

        tile_bytes = b_tile * per_batch_bytes
        vmem_need = 4 * tile_bytes + 4 * w_bytes + slack
        vmem_limit = int(min(max(vmem_need, 32 << 20), vmem_ceiling))

        kernel = functools.partial(_se_fused_kernel, inv_l=inv_l)
        out = pl.pallas_call(
            kernel,
            out_shape=jax.ShapeDtypeStruct((Bp, C, Lp), dtype),
            grid_spec=pltpu.PrefetchScalarGridSpec(
                num_scalar_prefetch=0,
                grid=(grid_len,),
                in_specs=[
                    pl.BlockSpec((b_tile, C, Lp), lambda b: (b, 0, 0)),
                    pl.BlockSpec((C, H), lambda b: (0, 0)),   # resident
                    pl.BlockSpec((H, C), lambda b: (0, 0)),   # resident
                ],
                out_specs=pl.BlockSpec((b_tile, C, Lp), lambda b: (b, 0, 0)),
            ),
            compiler_params=pltpu.CompilerParams(
                dimension_semantics=("parallel",),
                vmem_limit_bytes=vmem_limit,
            ),
            cost_estimate=cost,
            input_output_aliases=({0: 0} if donate_input else {}),
        )(xp, w1t, w2t)
        return out[:B, :, :L]

    # -------------------- two-pass L-tiled fallback (huge C*L per batch) --------------------
    # TODO(synk): if even a (1, C, 128) chunk exceeds the VMEM budget, C would need tiling too.
    l_tile = int(min(_round_up(L, 128),
                     max(128, (tile_budget // (C * itemsize)) // 128 * 128)))
    Lp2 = _round_up(L, l_tile)
    xp = _pad_to(x, 2, Lp2)
    n_l = Lp2 // l_tile
    grid2 = (B, n_l)

    tile_bytes = C * l_tile * itemsize
    vmem_need = 4 * tile_bytes + 4 * w_bytes + slack
    vmem_limit = int(min(max(vmem_need, 32 << 20), vmem_ceiling))

    se_k = functools.partial(_squeeze_excite_kernel, inv_l=inv_l)
    s = pl.pallas_call(
        se_k,
        out_shape=jax.ShapeDtypeStruct((B, C, 1), jnp.float32),
        grid_spec=pltpu.PrefetchScalarGridSpec(
            num_scalar_prefetch=0,
            grid=grid2,
            in_specs=[
                pl.BlockSpec((1, C, l_tile), lambda b, l: (b, 0, l)),
                pl.BlockSpec((C, H), lambda b, l: (0, 0)),
                pl.BlockSpec((H, C), lambda b, l: (0, 0)),
            ],
            out_specs=pl.BlockSpec((1, C, 1), lambda b, l: (b, 0, 0)),
            scratch_shapes=[pltpu.VMEM((1, C), jnp.float32)],
        ),
        compiler_params=pltpu.CompilerParams(
            dimension_semantics=("parallel", "arbitrary"),
            vmem_limit_bytes=vmem_limit,
        ),
    )(xp, w1t, w2t)

    out = pl.pallas_call(
        _scale_kernel,
        out_shape=jax.ShapeDtypeStruct((B, C, Lp2), dtype),
        grid_spec=pltpu.PrefetchScalarGridSpec(
            num_scalar_prefetch=0,
            grid=grid2,
            in_specs=[
                pl.BlockSpec((1, C, l_tile), lambda b, l: (b, 0, l)),
                pl.BlockSpec((1, C, 1), lambda b, l: (b, 0, 0)),
            ],
            out_specs=pl.BlockSpec((1, C, l_tile), lambda b, l: (b, 0, l)),
        ),
        compiler_params=pltpu.CompilerParams(
            dimension_semantics=("parallel", "parallel"),
            vmem_limit_bytes=vmem_limit,
        ),
        cost_estimate=cost,
    )(xp, s)
    return out[:, :, :L]


# ---------------------------------------------------------------------------
# Reference + test
# ---------------------------------------------------------------------------

def se_layer_ref(x, w1, w2):
    # Pure-JAX reference matching the PyTorch forward.
    y = jnp.mean(x, axis=-1)                      # (B, C)
    y = jnp.maximum(y @ w1.T, 0.0)                # (B, H)
    y = jax.nn.sigmoid(y @ w2.T)                  # (B, C)
    return x * y[:, :, None]


if __name__ == "__main__":
    B, C, L, reduction = 2, 64, 128, 32
    H = C // reduction

    key = jax.random.PRNGKey(0)
    kx, k1, k2 = jax.random.split(key, 3)

    x = jax.random.normal(kx, (B, C, L), dtype=jnp.float32)
    # PyTorch Linear weight layout: (out, in); both layers bias-free.
    w1 = jax.random.normal(k1, (H, C), dtype=jnp.float32) * 0.1   # Linear(C -> H)
    w2 = jax.random.normal(k2, (C, H), dtype=jnp.float32) * 0.1   # Linear(H -> C)

    out = se_layer(x, w1, w2)
    out = jax.block_until_ready(out)

    ref = se_layer_ref(x, w1, w2)
    assert out.shape == (B, C, L)
    assert jnp.allclose(out, ref, atol=1e-5, rtol=1e-5), "mismatch vs reference"

    print("KERNEL_OK")
</pallas_src>

<mosaic_0001>
module attributes {stable_mosaic.version = 11 : i64} {
  func.func @_se_fused_kernel(%arg0: i32, %arg1: memref<2x64x128xf32, #tpu.memory_space<vmem>>, %arg2: memref<64x2xf32, #tpu.memory_space<vmem>>, %arg3: memref<2x64xf32, #tpu.memory_space<vmem>>, %arg4: memref<2x64x128xf32, #tpu.memory_space<vmem>>) attributes {dimension_semantics = [#tpu.dimension_semantics<parallel>], iteration_bounds = array<i64: 1>, scalar_prefetch = 0 : i64, scratch_operands = 0 : i64, tpu.core_type = #tpu.core_type<tc>, window_params = [{transform_indices = @transform_0, window_bounds = array<i64: 2, 64, 128>}, {pipeline_mode = #tpu.pipeline_mode<synchronous>, transform_indices = @transform_1, window_bounds = array<i64: 64, 2>}, {pipeline_mode = #tpu.pipeline_mode<synchronous>, transform_indices = @transform_2, window_bounds = array<i64: 2, 64>}, {transform_indices = @transform_3, window_bounds = array<i64: 2, 64, 128>}]} {
    %c0 = arith.constant 0 : index
    %c0_0 = arith.constant 0 : index
    %c0_1 = arith.constant 0 : index
    %0 = vector.load %arg1[%c0, %c0_0, %c0_1] : memref<2x64x128xf32, #tpu.memory_space<vmem>>, vector<2x64x128xf32>
    %cst = arith.constant dense<0.000000e+00> : vector<2x64xf32>
    %1 = vector.multi_reduction <add>, %0, %cst [2] : vector<2x64x128xf32> to vector<2x64xf32>
    %cst_2 = arith.constant 7.812500e-03 : f32
    %2 = vector.broadcast %cst_2 : f32 to vector<2x64xf32>
    %3 = arith.mulf %1, %2 : vector<2x64xf32>
    %c0_3 = arith.constant 0 : index
    %c0_4 = arith.constant 0 : index
    %4 = vector.load %arg2[%c0_3, %c0_4] : memref<64x2xf32, #tpu.memory_space<vmem>>, vector<64x2xf32>
    %cst_5 = arith.constant dense<0.000000e+00> : vector<2x2xf32>
    %5 = tpu.matmul %3, %4, %cst_5 {dimension_numbers = #tpu.dot_dimension_numbers<[1], [0], [0], [1], [0, 0, 1, 1], [], []>} : vector<2x64xf32>, vector<64x2xf32>, vector<2x2xf32> -> vector<2x2xf32>
    %cst_6 = arith.constant 0.000000e+00 : f32
    %6 = vector.broadcast %cst_6 : f32 to vector<2x2xf32>
    %7 = arith.maximumf %5, %6 : vector<2x2xf32>
    %c0_7 = arith.constant 0 : index
    %c0_8 = arith.constant 0 : index
    %8 = vector.load %arg3[%c0_7, %c0_8] : memref<2x64xf32, #tpu.memory_space<vmem>>, vector<2x64xf32>
    %cst_9 = arith.constant dense<0.000000e+00> : vector<2x64xf32>
    %9 = tpu.matmul %7, %8, %cst_9 {dimension_numbers = #tpu.dot_dimension_numbers<[1], [0], [0], [1], [0, 0, 1, 1], [], []>} : vector<2x2xf32>, vector<2x64xf32>, vector<2x64xf32> -> vector<2x64xf32>
    %10 = arith.negf %9 : vector<2x64xf32>
    %11 = math.exp %10 : vector<2x64xf32>
    %cst_10 = arith.constant 1.000000e+00 : f32
    %12 = vector.broadcast %cst_10 : f32 to vector<2x64xf32>
    %13 = arith.addf %12, %11 : vector<2x64xf32>
    %14 = arith.divf %12, %13 : vector<2x64xf32>
    %15 = vector.shape_cast %14 : vector<2x64xf32> to vector<2x64x1xf32>
    %16 = vector.broadcast %15 : vector<2x64x1xf32> to vector<2x64x128xf32>
    %17 = arith.mulf %0, %16 : vector<2x64x128xf32>
    %c0_11 = arith.constant 0 : index
    %c0_12 = arith.constant 0 : index
    %c0_13 = arith.constant 0 : index
    %18 = vector.load %arg4[%c0_11, %c0_12, %c0_13] : memref<2x64x128xf32, #tpu.memory_space<vmem>>, vector<2x64x128xf32>
    tpu.vector_store %arg4[%c0_11, %c0_12, %c0_13], %17 {strides = array<i32>} : memref<2x64x128xf32, #tpu.memory_space<vmem>>, vector<2x64x128xf32>,
    return
  }
  func.func @transform_0(%arg0: i32) -> (i32, i32, i32) {
    %c0_i32 = arith.constant 0 : i32
    %c0_i32_0 = arith.constant 0 : i32
    %c0_i32_1 = arith.constant 0 : i32
    return %arg0, %c0_i32, %c0_i32_0 : i32, i32, i32
  }
  func.func @transform_1(%arg0: i32) -> (i32, i32) {
    %c0_i32 = arith.constant 0 : i32
    %c0_i32_0 = arith.constant 0 : i32
    %c0_i32_1 = arith.constant 0 : i32
    return %c0_i32, %c0_i32_0 : i32, i32
  }
  func.func @transform_2(%arg0: i32) -> (i32, i32) {
    %c0_i32 = arith.constant 0 : i32
    %c0_i32_0 = arith.constant 0 : i32
    %c0_i32_1 = arith.constant 0 : i32
    return %c0_i32, %c0_i32_0 : i32, i32
  }
  func.func @transform_3(%arg0: i32) -> (i32, i32, i32) {
    %c0_i32 = arith.constant 0 : i32
    %c0_i32_0 = arith.constant 0 : i32
    %c0_i32_1 = arith.constant 0 : i32
    return %arg0, %c0_i32, %c0_i32_0 : i32, i32, i32
  }
}

</mosaic_0001>

<bundles_post_ra>
// kernel: tpu_custom_call.1
= control target key start
LH: loop header
LB: loop body
LE: loop exit
PB: predicated region body
PF: predicated region fallthrough
CT: control target
= control target key end

     0   :  { %8 = vsyncpa [#allocation3], 0  ;;  %s737_s0 = inlined_call_operand.hbm [shape: f32[2,64,128], index: 0, kind: input, shape index: {}]   ;;  %s738_s1 = inlined_call_operand.vmem [shape: f32[64,2], index: 1, kind: input, shape index: {}]   ;;  %s739_s2 = inlined_call_operand.vmem [shape: f32[2,64], index: 2, kind: input, shape index: {}]   ;;  %s740_s3 = inlined_call_operand.hbm [shape: f32[2,64,128], index: 3, kind: output, shape index: {}]  }
   0x1   :  { %9 = vsyncpa [#allocation4], 0  ;;  %s584_s12 = smov [#allocation2]  }
   0x2   :  { %s15_s13 = sshll.u32 %s584_s12, 4  ;;  %s16_s13 = int_to_ptr.vmem [resolvable:$true] %s15_s13 }
   0x3   :  { %s548_s14 = scalar_lea.vmem %s16_s13, 2048  ;;  %p553_p1 = scmp.lt.s32.totalorder %s16_s13, %s16_s13 }
   0x4   :  { %p549_p0 = scmp.ne.s32.totalorder %s16_s13, %s548_s14  ;;  %p554_p2 = scmp.lt.s32.totalorder %s548_s14, %s548_s14 }
   0x6   :  { %p555_p3 = por %p554_p2, %p553_p1 }
   0x8   :  { %p556_p4 = pnand %p555_p3, %p549_p0 }
   0xa   :  { %559 = shalt.err (!%p556_p4)
}
   0xb   :  { %s585_s15 = smov 128   ;;  %s586_s16 = smov 8  }
   0xc   :  { %21 = dma.hbm_to_vmem [thread:$0]  %s737_s0, 2048, %s16_s13, [#allocation3], %s585_s15, %s585_s15, %s586_s16  }
   0xd   :  { %580 = dma.done.wait [#allocation3], 2048  }
   0xe   :  { %581 = vsyncadd [#allocation3], 4294965248  ;;  %v616_v0 = vld [vmem:[#allocation2 + $0x40] sm:$0xff]  ;;  %v622_v2 = vld [vmem:[#allocation2 + $0x48] sm:$0xff]  ;;  %v587_v17 = vmov 0.0   ;;  %vm588_vm0 = vmmov 0   ;;  %v117_v29 = vlaneseq }
   0xf   :  { %v618_v1 = vld [vmem:[#allocation2] sm:$0xff]  ;;  %61 = vadd.xlane.f32.xlu1 %v616_v0  ;;  %v624_v3 = vld [vmem:[#allocation2 + $0x8] sm:$0xff]  ;;  %v628_v4 = vld [vmem:[#allocation2 + $0x50] sm:$0xff]  ;;  %506 = vmatprep.subr.mxu0 %v587_v17  ;;  %vm128_vm1 = vcmask 130112   ;;  %vm135_vm2 = vcmask 195712   ;;  %vm142_vm3 = vcmask 261312  }
  0x10   :  { %45 = vadd.xlane.f32.xlu0 %v618_v1  ;;  %v630_v5 = vld [vmem:[#allocation2 + $0x10] sm:$0xff]  ;;  %v634_v6 = vld [vmem:[#allocation2 + $0x58] sm:$0xff]  ;;  %v640_v8 = vld [vmem:[#allocation2 + $0x60] sm:$0xff]  ;;  %525 = vmatprep.subr.mxu1 %v587_v17  ;;  %v118_v32 = vand.u32 127, %v117_v29  ;;  %v688_v33 = vshrl.u32 %v117_v29, 7  ;;  %vm149_vm4 = vcmask 326912  }
  0x11   :  { %v636_v7 = vld [vmem:[#allocation2 + $0x18] sm:$0xff]  ;;  %v642_v9 = vld [vmem:[#allocation2 + $0x20] sm:$0xff]  ;;  %v646_v10 = vld [vmem:[#allocation2 + $0x68] sm:$0xff]  ;;  %522 = vmatprep.mubr.msk.f32.mxu0 %vm588_vm0, %v587_v17  ;;  %527 = vmatprep.mubr.msk.f32.mxu1 %vm588_vm0, %v587_v17  ;;  %vm156_vm5 = vcmask 392512   ;;  %vm163_vm6 = vcmask 458112   ;;  %vm170_vm7 = vcmask 523712  }
  0x12   :  { %v648_v11 = vld [vmem:[#allocation2 + $0x28] sm:$0xff]  ;;  %v652_v12 = vld [vmem:[#allocation2 + $0x70] sm:$0xff]  ;;  %v658_v14 = vld [vmem:[#allocation2 + $0x78] sm:$0xff]  ;;  %v123_v36 = vadd.s32 4294967288, %v118_v32  ;;  %v130_v37 = vadd.s32 4294967280, %v118_v32  ;;  %v137_v38 = vadd.s32 4294967272, %v118_v32  ;;  %v121_v40 = vsub.s32 %v118_v32, %v688_v33 }
  0x13   :  { %63 = vadd.xlane.f32.xlu1 %v622_v2  ;;  %v654_v13 = vld [vmem:[#allocation2 + $0x30] sm:$0xff]  ;;  %v660_v15 = vld [vmem:[#allocation2 + $0x38] sm:$0xff]  ;;  %v98_v19 = vld [vmem:[%s738_s1 + $0x28] sm:$0xff]  ;;  %v144_v39 = vadd.s32 4294967264, %v118_v32  ;;  %v151_v45 = vadd.s32 4294967256, %v118_v32  ;;  %v158_v47 = vadd.s32 4294967248, %v118_v32 }
  0x14   :  { %47 = vadd.xlane.f32.xlu0 %v624_v3  ;;  %v100_v16 = vld [vmem:[%s738_s1 + $0x38] sm:$0xff]  ;;  %v99_v18 = vld [vmem:[%s738_s1 + $0x30] sm:$0xff]  ;;  %v97_v20 = vld [vmem:[%s738_s1 + $0x20] sm:$0xff]  ;;  %v126_v43 = vsub.s32 %v123_v36, %v688_v33  ;;  %v133_v44 = vsub.s32 %v130_v37, %v688_v33  ;;  %v140_v46 = vsub.s32 %v137_v38, %v688_v33  ;;  %v165_v63 = vadd.s32 4294967240, %v118_v32 }
  0x15   :  { %507 = vmatpush3.msra.mxu0 %v100_v16  ;;  %v96_v21 = vld [vmem:[%s738_s1 + $0x18] sm:$0xff]  ;;  %v95_v22 = vld [vmem:[%s738_s1 + $0x10] sm:$0xff]  ;;  %v94_v23 = vld [vmem:[%s738_s1 + $0x8] sm:$0xff]  ;;  %v147_v50 = vsub.s32 %v144_v39, %v688_v33  ;;  %v154_v59 = vsub.s32 %v151_v45, %v688_v33  ;;  %v161_v62 = vsub.s32 %v158_v47, %v688_v33  ;;  %vm211_vm8 = vcmask 1041409  }
  0x16   :  { %508 = vmatprep.subr.mxu0 %v587_v17  ;;  %v93_v24 = vld [vmem:[%s738_s1] sm:$0xff]  ;;  %vm213_vm9 = vcmask 523264   ;;  %vm292_vm10 = vcmask 1041408   ;;  %vm288_vm11 = vcmask 15360  }
  0x17   :  { %65 = vadd.xlane.f32.xlu1 %v628_v4  ;;  %509 = vmatpush3.msra.mxu0 %v99_v18 }
  0x18   :  { %49 = vadd.xlane.f32.xlu0 %v630_v5  ;;  %510 = vmatprep.subr.mxu0 %v587_v17 }
  0x19   :  { %511 = vmatpush3.msra.mxu0 %v98_v19 }
  0x1a   :  { %512 = vmatprep.subr.mxu0 %v587_v17 }
  0x1b   :  { %67 = vadd.xlane.f32.xlu1 %v634_v6  ;;  %513 = vmatpush3.msra.mxu0 %v97_v20 }
  0x1c   :  { %51 = vadd.xlane.f32.xlu0 %v636_v7  ;;  %514 = vmatprep.subr.mxu0 %v587_v17 }
  0x1d   :  { %515 = vmatpush3.msra.mxu0 %v96_v21 }
  0x1e   :  { %516 = vmatprep.subr.mxu0 %v587_v17 }
  0x1f   :  { %69 = vadd.xlane.f32.xlu1 %v640_v8  ;;  %517 = vmatpush3.msra.mxu0 %v95_v22 }
  0x20   :  { %53 = vadd.xlane.f32.xlu0 %v642_v9  ;;  %518 = vmatprep.subr.mxu0 %v587_v17 }
  0x21   :  { %519 = vmatpush3.msra.mxu0 %v94_v23 }
  0x22   :  { %520 = vmatprep.subr.mxu0 %v587_v17 }
  0x23   :  { %71 = vadd.xlane.f32.xlu1 %v646_v10  ;;  %521 = vmatpush3.msra.mxu0 %v93_v24 }
  0x24   :  { %55 = vadd.xlane.f32.xlu0 %v648_v11 }
  0x27   :  { %73 = vadd.xlane.f32.xlu1 %v652_v12 }
  0x28   :  { %57 = vadd.xlane.f32.xlu0 %v654_v13 }
  0x2b   :  { %75 = vadd.xlane.f32.xlu1 %v658_v14 }
  0x2c   :  { %59 = vadd.xlane.f32.xlu0 %v660_v15 }
  0x98   :  { %v62_v25 = vpop.xlane.xlu1 %61 }
  0x99   :  { %v46_v26 = vpop.xlane.xlu0 %45  ;;  %v85_v51 = vmul.f32 0.0078125, %v62_v25 }
  0x9a   :  { %v77_v52 = vmul.f32 0.0078125, %v46_v26 }
  0x9b   :  { %v175_v20 = vrot.slane %v85_v51, %v121_v40 }
  0x9c   :  { %v64_v27 = vpop.xlane.xlu1 %63  ;;  %v122_v21 = vrot.slane %v77_v52, %v121_v40 }
  0x9d   :  { %v48_v28 = vpop.xlane.xlu0 %47  ;;  %v86_v48 = vmul.f32 0.0078125, %v64_v27 }
  0x9e   :  { %v78_v49 = vmul.f32 0.0078125, %v48_v28 }
  0x9f   :  { %v179_v16 = vrot.slane %v86_v48, %v126_v43 }
  0xa0   :  { %v66_v30 = vpop.xlane.xlu1 %65  ;;  %v127_v17 = vrot.slane %v78_v49, %v126_v43 }
  0xa1   :  { %v50_v31 = vpop.xlane.xlu0 %49  ;;  %v87_v53 = vmul.f32 0.0078125, %v66_v30  ;;  %v180_v32 = vsel %vm128_vm1, %v179_v16, %v175_v20  ;;  %v374_v20 = vsub.s32 0, %v688_v33 }
  0xa2   :  { %v79_v54 = vmul.f32 0.0078125, %v50_v31 }
  0xa3   :  { %v184_v22 = vrot.slane %v87_v53, %v133_v44 }
  0xa4   :  { %v68_v34 = vpop.xlane.xlu1 %67  ;;  %v134_v23 = vrot.slane %v79_v54, %v133_v44 }
  0xa5   :  { %v52_v35 = vpop.xlane.xlu0 %51  ;;  %v88_v57 = vmul.f32 0.0078125, %v68_v34  ;;  %v168_v34 = vsub.s32 %v165_v63, %v688_v33  ;;  %v185_v38 = vsel %vm135_vm2, %v184_v22, %v180_v32 }
  0xa6   :  { %v80_v58 = vmul.f32 0.0078125, %v52_v35  ;;  %v129_v35 = vsel %vm128_vm1, %v127_v17, %v122_v21 }
  0xa7   :  { %v189_v26 = vrot.slane %v88_v57, %v140_v46  ;;  %v136_v39 = vsel %vm135_vm2, %v134_v23, %v129_v35  ;;  %v409_v23 = vsub.s32 1, %v688_v33 }
  0xa8   :  { %v70_v41 = vpop.xlane.xlu1 %69  ;;  %v141_v27 = vrot.slane %v80_v58, %v140_v46 }
  0xa9   :  { %v54_v42 = vpop.xlane.xlu0 %53  ;;  %v89_v60 = vmul.f32 0.0078125, %v70_v41  ;;  %v190_v44 = vsel %vm142_vm3, %v189_v26, %v185_v38 }
  0xaa   :  { %v81_v61 = vmul.f32 0.0078125, %v54_v42  ;;  %v143_v45 = vsel %vm142_vm3, %v141_v27, %v136_v39 }
  0xab   :  { %v194_v30 = vrot.slane %v89_v60, %v147_v50 }
  0xac   :  { %v72_v55 = vpop.xlane.xlu1 %71  ;;  %v148_v31 = vrot.slane %v81_v61, %v147_v50 }
  0xad   :  { %v56_v56 = vpop.xlane.xlu0 %55  ;;  %v90_v18 = vmul.f32 0.0078125, %v72_v55  ;;  %v195_v48 = vsel %vm149_vm4, %v194_v30, %v190_v44 }
  0xae   :  { %v82_v19 = vmul.f32 0.0078125, %v56_v56  ;;  %v150_v49 = vsel %vm149_vm4, %v148_v31, %v143_v45 }
  0xaf   :  { %v199_v36 = vrot.slane %v90_v18, %v154_v59 }
  0xb0   :  { %v74_v24 = vpop.xlane.xlu1 %73  ;;  %v155_v37 = vrot.slane %v82_v19, %v154_v59  ;;  %v287_v59 = vld [vmem:[%s739_s2] sm:$0x3]  ;;  %s589_s2 = smov [#allocation5]  }
  0xb1   :  { %v58_v25 = vpop.xlane.xlu0 %57  ;;  %v91_v28 = vmul.f32 0.0078125, %v74_v24  ;;  %v200_v50 = vsel %vm156_vm5, %v199_v36, %v195_v48  ;;  %526 = vmatpush3.msk.msra.mxu1 %vm292_vm10, %v287_v59  ;;  %s479_s8 = sshll.u32 %s589_s2, 4  ;;  %s480_s8 = int_to_ptr.vmem [resolvable:$true] %s479_s8 }
  0xb2   :  { %v83_v29 = vmul.f32 0.0078125, %v58_v25  ;;  %v157_v51 = vsel %vm156_vm5, %v155_v37, %v150_v49  ;;  %s560_s9 = scalar_lea.vmem %s480_s8, 2048  ;;  %p565_p6 = scmp.lt.s32.totalorder %s480_s8, %s480_s8 }
  0xb3   :  { %v204_v40 = vrot.slane %v91_v28, %v161_v62  ;;  %p561_p5 = scmp.ne.s32.totalorder %s480_s8, %s560_s9  ;;  %p566_p7 = scmp.lt.s32.totalorder %s560_s9, %s560_s9 }
  0xb4   :  { %v162_v41 = vrot.slane %v83_v29, %v161_v62  ;;  %v76_v42 = vpop.xlane.xlu1 %75 }
  0xb5   :  { %v60_v43 = vpop.xlane.xlu0 %59  ;;  %v92_v46 = vmul.f32 0.0078125, %v76_v42  ;;  %v205_v54 = vsel %vm163_vm6, %v204_v40, %v200_v50  ;;  %p567_p8 = por %p566_p7, %p565_p6 }
  0xb6   :  { %v84_v47 = vmul.f32 0.0078125, %v60_v43  ;;  %v164_v55 = vsel %vm163_vm6, %v162_v41, %v157_v51 }
  0xb7   :  { %v209_v52 = vrot.slane %v92_v46, %v168_v34  ;;  %p568_p9 = pnand %p567_p8, %p561_p5 }
  0xb8   :  { %v169_v53 = vrot.slane %v84_v47, %v168_v34 }
  0xb9   :  { %v210_v57 = vsel %vm170_vm7, %v209_v52, %v205_v54 }
  0xba   :  { %v171_v56 = vsel %vm170_vm7, %v169_v53, %v164_v55 }
  0xbb   :  { %v212_v58 = vsel %vm211_vm8, %v210_v57, %v171_v56 }
  0xbc   :  { %523 = vmatmul.mubr.msk.f32.vlgmr.msra.gmra.mxu0 %vm213_vm9, %v212_v58 }
 0x17c   :  { %v282_v60 = vpop.f32.mrf.mxu0 }
 0x17d   :  { %v286_v61 = vmax.f32 %v282_v60, 0.0 }
 0x17e   :  { %v524_v62 = vpop.f32.mrf.mxu0 }
 0x17f   :  { %528 = vmatmul.mubr.msk.f32.vlgmr.msra.gmra.mxu1 %vm288_vm11, %v286_v61 }
 0x23f   :  { %v362_v63 = vpop.f32.mrf.mxu1 }
 0x240   :  { %v494_v16 = vmul.f32 -1.442695, %v362_v63 }
 0x241   :  { %v529_v17 = vpop.f32.mrf.mxu1 }
 0x242   :  { %536 = vpow2.f32 %v494_v16 }
 0x24f   :  { %v537_v18 = vpop.eup %536 }
 0x250   :  { %v369_v19 = vadd.f32 1.0, %v537_v18 }
 0x252   :  { %538 = vrcp.f32 %v369_v19 }
 0x25f   :  { %v539_v21 = vpop.eup %538 }
 0x260   :  { %v375_v22 = vrot.slane %v539_v21, %v374_v20  ;;  %v410_v24 = vrot.slane %v539_v21, %v409_v23 }
 0x262   :  { %381 = vbcast.lane.b32.xlu1 %v375_v22, 264  ;;  %377 = vbcast.lane.b32.xlu0 %v375_v22, 256 }
 0x266   :  { %385 = vbcast.lane.b32.xlu1 %v375_v22, 272  ;;  %393 = vbcast.lane.b32.xlu0 %v375_v22, 288 }
 0x26a   :  { %389 = vbcast.lane.b32.xlu1 %v375_v22, 280  ;;  %401 = vbcast.lane.b32.xlu0 %v375_v22, 304 }
 0x26e   :  { %397 = vbcast.lane.b32.xlu1 %v375_v22, 296  ;;  %412 = vbcast.lane.b32.xlu0 %v410_v24, 256 }
 0x272   :  { %405 = vbcast.lane.b32.xlu1 %v375_v22, 312  ;;  %420 = vbcast.lane.b32.xlu0 %v410_v24, 272 }
 0x276   :  { %416 = vbcast.lane.b32.xlu1 %v410_v24, 264  ;;  %428 = vbcast.lane.b32.xlu0 %v410_v24, 288 }
 0x27a   :  { %424 = vbcast.lane.b32.xlu1 %v410_v24, 280  ;;  %436 = vbcast.lane.b32.xlu0 %v410_v24, 304 }
 0x27e   :  { %432 = vbcast.lane.b32.xlu1 %v410_v24, 296 }
 0x282   :  { %440 = vbcast.lane.b32.xlu1 %v410_v24, 312 }
 0x2d4   :  { %v382_v25 = vpop.permute.xlu1 %381  ;;  %v378_v26 = vpop.permute.xlu0 %377 }
 0x2d5   :  { %v443_v27 = vmul.f32 %v382_v25, %v624_v3  ;;  %v442_v28 = vmul.f32 %v378_v26, %v618_v1 }
 0x2d7   :  { %459 = vst [vmem:[#allocation5 + $0x8] sm:$0xff] %v443_v27  ;;  %458 = vst [vmem:[#allocation5] sm:$0xff] %v442_v28 }
 0x2d8   :  { %v386_v33 = vpop.permute.xlu1 %385  ;;  %v394_v29 = vpop.permute.xlu0 %393 }
 0x2d9   :  { %v444_v30 = vmul.f32 %v386_v33, %v630_v5  ;;  %v446_v31 = vmul.f32 %v394_v29, %v642_v9 }
 0x2db   :  { %460 = vst [vmem:[#allocation5 + $0x10] sm:$0xff] %v444_v30  ;;  %462 = vst [vmem:[#allocation5 + $0x20] sm:$0xff] %v446_v31 }
 0x2dc   :  { %v390_v34 = vpop.permute.xlu1 %389  ;;  %v402_v32 = vpop.permute.xlu0 %401 }
 0x2dd   :  { %v445_v35 = vmul.f32 %v390_v34, %v636_v7  ;;  %v448_v36 = vmul.f32 %v402_v32, %v654_v13 }
 0x2df   :  { %461 = vst [vmem:[#allocation5 + $0x18] sm:$0xff] %v445_v35  ;;  %464 = vst [vmem:[#allocation5 + $0x30] sm:$0xff] %v448_v36 }
 0x2e0   :  { %v398_v3 = vpop.permute.xlu1 %397  ;;  %v413_v1 = vpop.permute.xlu0 %412 }
 0x2e1   :  { %v447_v37 = vmul.f32 %v398_v3, %v648_v11  ;;  %v450_v38 = vmul.f32 %v413_v1, %v616_v0 }
 0x2e3   :  { %463 = vst [vmem:[#allocation5 + $0x28] sm:$0xff] %v447_v37  ;;  %466 = vst [vmem:[#allocation5 + $0x40] sm:$0xff] %v450_v38 }
 0x2e4   :  { %v406_v5 = vpop.permute.xlu1 %405  ;;  %v421_v9 = vpop.permute.xlu0 %420 }
 0x2e5   :  { %v449_v39 = vmul.f32 %v406_v5, %v660_v15  ;;  %v452_v40 = vmul.f32 %v421_v9, %v628_v4 }
 0x2e7   :  { %465 = vst [vmem:[#allocation5 + $0x38] sm:$0xff] %v449_v39  ;;  %468 = vst [vmem:[#allocation5 + $0x50] sm:$0xff] %v452_v40 }
 0x2e8   :  { %v417_v7 = vpop.permute.xlu1 %416  ;;  %v429_v13 = vpop.permute.xlu0 %428 }
 0x2e9   :  { %v451_v41 = vmul.f32 %v417_v7, %v622_v2  ;;  %v454_v42 = vmul.f32 %v429_v13, %v640_v8 }
 0x2eb   :  { %467 = vst [vmem:[#allocation5 + $0x48] sm:$0xff] %v451_v41  ;;  %470 = vst [vmem:[#allocation5 + $0x60] sm:$0xff] %v454_v42 }
 0x2ec   :  { %v425_v11 = vpop.permute.xlu1 %424  ;;  %v437_v0 = vpop.permute.xlu0 %436 }
 0x2ed   :  { %v453_v43 = vmul.f32 %v425_v11, %v634_v6  ;;  %v456_v44 = vmul.f32 %v437_v0, %v652_v12 }
 0x2ef   :  { %469 = vst [vmem:[#allocation5 + $0x58] sm:$0xff] %v453_v43  ;;  %472 = vst [vmem:[#allocation5 + $0x70] sm:$0xff] %v456_v44 }
 0x2f0   :  { %v433_v15 = vpop.permute.xlu1 %432 }
 0x2f1   :  { %v455_v4 = vmul.f32 %v433_v15, %v646_v10 }
 0x2f3   :  { %471 = vst [vmem:[#allocation5 + $0x68] sm:$0xff] %v455_v4 }
 0x2f4   :  { %v441_v45 = vpop.permute.xlu1 %440 }
 0x2f5   :  { %v457_v2 = vmul.f32 %v441_v45, %v658_v14 }
 0x2f7   :  { %473 = vst [vmem:[#allocation5 + $0x78] sm:$0xff] %v457_v2 }
 0x2f8   :  { %571 = shalt.err (!%p568_p9)
}
 0x2f9   :  { %485 = dma.vmem_to_hbm [thread:$0]  %s480_s8, 2048, %s740_s3, [#allocation4], %s585_s15, %s585_s15, %s586_s16  }
 0x2fa   :  { %582 = dma.done.wait [#allocation4], 2048  }
 0x2fb   :  { %583 = vsyncadd [#allocation4], 4294965248 }
 0x2fc   :  { %489 = vsyncpa [#allocation3], 1 }
 0x2fd   :  { %490 = vsyncpa [#allocation4], 1 }

</bundles_post_ra>
